<compile_context>
chip_gen: v5e
topology: v5e:2x2
jax: 0.10.0
libtpu: 0.0.40
codegen_flags: <defaults>
</compile_context>

<pallas_src>
import math

import jax
import jax.numpy as jnp
from jax.experimental import pallas as pl
from jax.experimental.pallas import tpu as pltpu


def _round_up(n, m):
    return ((n + m - 1) // m) * m


def _sublane(dtype):
    # sublane tile: 8 for 4-byte, 16 for 2-byte, 32 for 1-byte dtypes
    return {4: 8, 2: 16, 1: 32}.get(jnp.dtype(dtype).itemsize, 8)


def _make_nac_kernel(Tc, carry_hidden):
    """Tc: time steps per grid iteration. carry_hidden: feed y_t back as h_{t+1}."""

    def kernel(pre_ref, h0_ref, wh_ref, o_ref, h_ref):
        # grid = (batch_blocks, time_chunks); time is innermost ("arbitrary").
        tc = pl.program_id(1)

        # (Re)initialize the carried hidden state at the start of each batch block's
        # time sweep (time resets to 0 whenever the batch block advances).
        @pl.when(tc == 0)
        def _():
            h_ref[...] = h0_ref[...]

        if carry_hidden:
            # Fully-unrolled recurrent chain over this chunk. Tc is a compile-time
            # constant, so every slice below is static (lane/sublane aligned) and the
            # LLO scheduler sees the whole chunk at once.
            for s in range(Tc):
                rec = jnp.dot(h_ref[...], wh_ref[...],
                              preferred_element_type=jnp.float32)
                y = jnp.tanh(pre_ref[s].astype(jnp.float32) + rec)
                o_ref[s] = y.astype(o_ref.dtype)
                h_ref[...] = y.astype(h_ref.dtype)  # h_{t+1} = y_t (out_dim == in_dim)
        else:
            # Hidden state is constant across steps (module's single-step forward):
            # hoist the recurrent matmul out of the chunk loop entirely.
            rec = jnp.dot(h0_ref[...], wh_ref[...],
                          preferred_element_type=jnp.float32)
            for s in range(Tc):
                o_ref[s] = jnp.tanh(
                    pre_ref[s].astype(jnp.float32) + rec).astype(o_ref.dtype)

    return kernel


def _nac_pallas(x_seq, h0, W, W_hidden, carry_hidden, *, time_chunk=8,
                batch_block=None):
    """x_seq: (T, B, in_dim); h0: (B, in_dim);
       W: (out_dim, in_dim); W_hidden: (hidden_dim, in_dim); out_dim == hidden_dim.

       carry_hidden=True  -> recurrent scan: h_{t+1} = y_t (requires out_dim == in_dim).
       carry_hidden=False -> the hidden state stays h0 for every step (this is the
                             module's single-step forward; also valid for T > 1 as a
                             batched non-recurrent forward)."""
    T, B, in_dim = x_seq.shape
    out_dim = W.shape[0]
    hidden_dim = W_hidden.shape[0]
    assert W.shape[1] == in_dim and W_hidden.shape[1] == in_dim
    assert out_dim == hidden_dim, "out_dim must equal hidden_dim for the add"
    if carry_hidden:
        assert out_dim == in_dim, (
            "recurrent scan feeds y_t back as the next hidden input -> out_dim == in_dim")

    dtype = x_seq.dtype
    itemsize = jnp.dtype(dtype).itemsize
    sub = _sublane(dtype)

    Dp = _round_up(in_dim, 128)           # padded hidden-input feature width (lanes)
    Np = _round_up(out_dim, 128)          # padded output feature width (lanes)
    Bp = _round_up(B, sub)                # padded batch (sublane tile)
    Tc = max(1, min(time_chunk, T))       # time steps per grid iteration
    Tp = _round_up(T, Tc)                 # padded time; extra steps are sliced off
    TB = Bp if batch_block is None else batch_block
    assert Bp % TB == 0 and TB % sub == 0, "batch_block must tile the padded batch"

    # ---- one-time prep hoisted out of the serial per-step chain ----
    # Non-recurrent half as ONE large (T*B, in_dim) x (in_dim, out_dim) GEMM in XLA.
    pre = jnp.einsum("tbi,oi->tbo", x_seq, W.astype(dtype),
                     preferred_element_type=jnp.float32).astype(dtype)

    pre_p = jnp.zeros((Tp, Bp, Np), dtype).at[:T, :B, :out_dim].set(pre)
    h0_p = jnp.zeros((Bp, Dp), dtype).at[:B, :in_dim].set(h0.astype(dtype))
    wh_p = jnp.zeros((Dp, Np), dtype).at[:in_dim, :out_dim].set(
        W_hidden.T.astype(dtype))

    kernel = _make_nac_kernel(Tc, carry_hidden)

    cost = pl.CostEstimate(
        flops=2 * Tp * Bp * Dp * Np,
        transcendentals=Tp * Bp * Np,
        bytes_accessed=itemsize * (2 * Tp * Bp * Np + Bp * Dp + Dp * Np),
    )

    out_p = pl.pallas_call(
        kernel,
        out_shape=jax.ShapeDtypeStruct((Tp, Bp, Np), dtype),
        grid=(Bp // TB, Tp // Tc),
        in_specs=[
            pl.BlockSpec((Tc, TB, Np), lambda b, t: (t, b, 0)),  # pre_t streams per chunk
            pl.BlockSpec((TB, Dp), lambda b, t: (b, 0)),         # h0: resident per batch blk
            pl.BlockSpec((Dp, Np), lambda b, t: (0, 0)),         # W_hidden.T: resident
        ],
        out_specs=pl.BlockSpec((Tc, TB, Np), lambda b, t: (t, b, 0)),
        scratch_shapes=[pltpu.VMEM((TB, Dp), dtype)],            # carried hidden state h
        compiler_params=pltpu.CompilerParams(
            # batch blocks are independent (v7x megacore split); time is a serial
            # recurrence.
            dimension_semantics=("parallel", "arbitrary"),
        ),
        cost_estimate=cost,
    )(pre_p, h0_p, wh_p)

    return out_p[:T, :B, :out_dim]


def nac_recurrent_forward(inputs, hidden_prev, W, W_hidden):
    """Single-step forward, identical to the PyTorch module's forward()."""
    out = _nac_pallas(inputs[None], hidden_prev, W, W_hidden, carry_hidden=False)
    return out[0]


def nac_recurrent_scan(x_seq, h0, W, W_hidden, *, time_chunk=8, batch_block=None):
    """Fused recurrent scan: applies the NAC cell over all T steps, carrying the
    hidden state in VMEM scratch. Returns (T, B, out_dim) of all hidden states."""
    return _nac_pallas(x_seq, h0, W, W_hidden, carry_hidden=True,
                       time_chunk=time_chunk, batch_block=batch_block)


def kaiming_uniform(key, shape, a=math.sqrt(5)):
    # torch.nn.init.kaiming_uniform_ with a=sqrt(5): bound = sqrt(6/((1+a^2)*fan_in))
    fan_in = shape[1]
    bound = math.sqrt(6.0 / ((1.0 + a * a) * fan_in))
    return jax.random.uniform(key, shape, jnp.float32, -bound, bound)


if __name__ == "__main__":
    # Small shapes consistent with the module; recurrence requires in==out==hidden.
    T, B, in_dim = 8, 8, 32
    out_dim = hidden_dim = in_dim

    key = jax.random.PRNGKey(0)
    k_wh, k_mh, k_whh, k_mhh, k_x, k_h = jax.random.split(key, 6)

    # Parameter init mirroring __init__.
    W_hat = kaiming_uniform(k_wh, (out_dim, in_dim))
    M_hat = kaiming_uniform(k_mh, (out_dim, in_dim))
    W_hat_hidden = kaiming_uniform(k_whh, (hidden_dim, in_dim))
    M_hat_hidden = kaiming_uniform(k_mhh, (hidden_dim, in_dim))

    W = jnp.tanh(W_hat) * jax.nn.sigmoid(M_hat)
    W_hidden = jnp.tanh(W_hat_hidden) * jax.nn.sigmoid(M_hat_hidden)

    x_seq = jax.random.normal(k_x, (T, B, in_dim), jnp.float32)
    h0 = jax.random.normal(k_h, (B, in_dim), jnp.float32)

    # --- fused recurrent scan (time-chunked grid, hidden state carried in VMEM) ---
    hs = jax.block_until_ready(nac_recurrent_scan(x_seq, h0, W, W_hidden))

    # Pure-JAX reference scan.
    def step(h, x):
        y = jnp.tanh(x @ W.T + h @ W_hidden.T)
        return y, y

    _, hs_ref = jax.lax.scan(step, h0, x_seq)
    assert hs.shape == (T, B, out_dim)
    assert jnp.allclose(hs, hs_ref, atol=1e-5, rtol=1e-5)

    # --- single-step forward (matches the module's forward exactly) ---
    out1 = jax.block_until_ready(nac_recurrent_forward(x_seq[0], h0, W, W_hidden))
    ref1 = jnp.tanh(x_seq[0] @ W.T + h0 @ W_hidden.T)
    assert out1.shape == (B, out_dim)
    assert jnp.allclose(out1, ref1, atol=1e-5, rtol=1e-5)

    print("KERNEL_OK")
</pallas_src>

<mosaic_0001>
module attributes {stable_mosaic.version = 11 : i64} {
  func.func @kernel(%arg0: i32, %arg1: i32, %arg2: memref<8x8x128xf32, #tpu.memory_space<vmem>>, %arg3: memref<8x128xf32, #tpu.memory_space<vmem>>, %arg4: memref<128x128xf32, #tpu.memory_space<vmem>>, %arg5: memref<8x8x128xf32, #tpu.memory_space<vmem>>, %arg6: memref<8x128xf32, #tpu.memory_space<vmem>>) attributes {dimension_semantics = [#tpu.dimension_semantics<parallel>, #tpu.dimension_semantics<arbitrary>], iteration_bounds = array<i64: 1, 1>, scalar_prefetch = 0 : i64, scratch_operands = 1 : i64, tpu.core_type = #tpu.core_type<tc>, window_params = [{transform_indices = @transform_0, window_bounds = array<i64: 8, 8, 128>}, {transform_indices = @transform_1, window_bounds = array<i64: 8, 128>}, {pipeline_mode = #tpu.pipeline_mode<synchronous>, transform_indices = @transform_2, window_bounds = array<i64: 128, 128>}, {transform_indices = @transform_3, window_bounds = array<i64: 8, 8, 128>}]} {
    %c0_i32 = arith.constant 0 : i32
    %0 = arith.cmpi eq, %arg1, %c0_i32 : i32
    %1 = arith.extui %0 : i1 to i32
    %c0_i32_0 = arith.constant 0 : i32
    %2 = arith.cmpi ne, %1, %c0_i32_0 : i32
    scf.if %2 {
      %c0_96 = arith.constant 0 : index
      %c0_97 = arith.constant 0 : index
      %91 = vector.load %arg3[%c0_96, %c0_97] : memref<8x128xf32, #tpu.memory_space<vmem>>, vector<8x128xf32>
      %c0_98 = arith.constant 0 : index
      %c0_99 = arith.constant 0 : index
      %92 = vector.load %arg6[%c0_98, %c0_99] : memref<8x128xf32, #tpu.memory_space<vmem>>, vector<8x128xf32>
      tpu.vector_store %arg6[%c0_98, %c0_99], %91 {strides = array<i32>} : memref<8x128xf32, #tpu.memory_space<vmem>>, vector<8x128xf32>,
    } else {
    }
    %c0 = arith.constant 0 : index
    %c0_1 = arith.constant 0 : index
    %3 = vector.load %arg6[%c0, %c0_1] : memref<8x128xf32, #tpu.memory_space<vmem>>, vector<8x128xf32>
    %c0_2 = arith.constant 0 : index
    %c0_3 = arith.constant 0 : index
    %4 = vector.load %arg4[%c0_2, %c0_3] : memref<128x128xf32, #tpu.memory_space<vmem>>, vector<128x128xf32>
    %cst = arith.constant dense<0.000000e+00> : vector<8x128xf32>
    %5 = tpu.matmul %3, %4, %cst {dimension_numbers = #tpu.dot_dimension_numbers<[1], [0], [0], [1], [0, 0, 1, 1], [], []>} : vector<8x128xf32>, vector<128x128xf32>, vector<8x128xf32> -> vector<8x128xf32>
    %c0_4 = arith.constant 0 : index
    %c0_5 = arith.constant 0 : index
    %c0_6 = arith.constant 0 : index
    %6 = vector.load %arg2[%c0_4, %c0_5, %c0_6] : memref<8x8x128xf32, #tpu.memory_space<vmem>>, vector<1x8x128xf32>
    %7 = vector.shape_cast %6 : vector<1x8x128xf32> to vector<8x128xf32>
    %8 = arith.addf %7, %5 : vector<8x128xf32>
    %9 = math.tanh %8 : vector<8x128xf32>
    %c0_7 = arith.constant 0 : index
    %c0_8 = arith.constant 0 : index
    %c0_9 = arith.constant 0 : index
    %10 = vector.load %arg5[%c0_7, %c0_8, %c0_9] : memref<8x8x128xf32, #tpu.memory_space<vmem>>, vector<1x8x128xf32>
    %11 = vector.shape_cast %10 : vector<1x8x128xf32> to vector<8x128xf32>
    %12 = vector.shape_cast %9 : vector<8x128xf32> to vector<1x8x128xf32>
    tpu.vector_store %arg5[%c0_7, %c0_8, %c0_9], %12 {strides = array<i32>} : memref<8x8x128xf32, #tpu.memory_space<vmem>>, vector<1x8x128xf32>,
    %c0_10 = arith.constant 0 : index
    %c0_11 = arith.constant 0 : index
    %13 = vector.load %arg6[%c0_10, %c0_11] : memref<8x128xf32, #tpu.memory_space<vmem>>, vector<8x128xf32>
    tpu.vector_store %arg6[%c0_10, %c0_11], %9 {strides = array<i32>} : memref<8x128xf32, #tpu.memory_space<vmem>>, vector<8x128xf32>,
    %c0_12 = arith.constant 0 : index
    %c0_13 = arith.constant 0 : index
    %14 = vector.load %arg6[%c0_12, %c0_13] : memref<8x128xf32, #tpu.memory_space<vmem>>, vector<8x128xf32>
    %c0_14 = arith.constant 0 : index
    %c0_15 = arith.constant 0 : index
    %15 = vector.load %arg4[%c0_14, %c0_15] : memref<128x128xf32, #tpu.memory_space<vmem>>, vector<128x128xf32>
    %cst_16 = arith.constant dense<0.000000e+00> : vector<8x128xf32>
    %16 = tpu.matmul %14, %15, %cst_16 {dimension_numbers = #tpu.dot_dimension_numbers<[1], [0], [0], [1], [0, 0, 1, 1], [], []>} : vector<8x128xf32>, vector<128x128xf32>, vector<8x128xf32> -> vector<8x128xf32>
    %c1 = arith.constant 1 : index
    %c0_17 = arith.constant 0 : index
    %c0_18 = arith.constant 0 : index
    %17 = vector.load %arg2[%c1, %c0_17, %c0_18] : memref<8x8x128xf32, #tpu.memory_space<vmem>>, vector<1x8x128xf32>
    %18 = vector.shape_cast %17 : vector<1x8x128xf32> to vector<8x128xf32>
    %19 = arith.addf %18, %16 : vector<8x128xf32>
    %20 = math.tanh %19 : vector<8x128xf32>
    %c1_19 = arith.constant 1 : index
    %c0_20 = arith.constant 0 : index
    %c0_21 = arith.constant 0 : index
    %21 = vector.load %arg5[%c1_19, %c0_20, %c0_21] : memref<8x8x128xf32, #tpu.memory_space<vmem>>, vector<1x8x128xf32>
    %22 = vector.shape_cast %21 : vector<1x8x128xf32> to vector<8x128xf32>
    %23 = vector.shape_cast %20 : vector<8x128xf32> to vector<1x8x128xf32>
    tpu.vector_store %arg5[%c1_19, %c0_20, %c0_21], %23 {strides = array<i32>} : memref<8x8x128xf32, #tpu.memory_space<vmem>>, vector<1x8x128xf32>,
    %c0_22 = arith.constant 0 : index
    %c0_23 = arith.constant 0 : index
    %24 = vector.load %arg6[%c0_22, %c0_23] : memref<8x128xf32, #tpu.memory_space<vmem>>, vector<8x128xf32>
    tpu.vector_store %arg6[%c0_22, %c0_23], %20 {strides = array<i32>} : memref<8x128xf32, #tpu.memory_space<vmem>>, vector<8x128xf32>,
    %c0_24 = arith.constant 0 : index
    %c0_25 = arith.constant 0 : index
    %25 = vector.load %arg6[%c0_24, %c0_25] : memref<8x128xf32, #tpu.memory_space<vmem>>, vector<8x128xf32>
    %c0_26 = arith.constant 0 : index
    %c0_27 = arith.constant 0 : index
    %26 = vector.load %arg4[%c0_26, %c0_27] : memref<128x128xf32, #tpu.memory_space<vmem>>, vector<128x128xf32>
    %cst_28 = arith.constant dense<0.000000e+00> : vector<8x128xf32>
    %27 = tpu.matmul %25, %26, %cst_28 {dimension_numbers = #tpu.dot_dimension_numbers<[1], [0], [0], [1], [0, 0, 1, 1], [], []>} : vector<8x128xf32>, vector<128x128xf32>, vector<8x128xf32> -> vector<8x128xf32>
    %c2 = arith.constant 2 : index
    %c0_29 = arith.constant 0 : index
    %c0_30 = arith.constant 0 : index
    %28 = vector.load %arg2[%c2, %c0_29, %c0_30] : memref<8x8x128xf32, #tpu.memory_space<vmem>>, vector<1x8x128xf32>
    %29 = vector.shape_cast %28 : vector<1x8x128xf32> to vector<8x128xf32>
    %30 = arith.addf %29, %27 : vector<8x128xf32>
    %31 = math.tanh %30 : vector<8x128xf32>
    %c2_31 = arith.constant 2 : index
    %c0_32 = arith.constant 0 : index
    %c0_33 = arith.constant 0 : index
    %32 = vector.load %arg5[%c2_31, %c0_32, %c0_33] : memref<8x8x128xf32, #tpu.memory_space<vmem>>, vector<1x8x128xf32>
    %33 = vector.shape_cast %32 : vector<1x8x128xf32> to vector<8x128xf32>
    %34 = vector.shape_cast %31 : vector<8x128xf32> to vector<1x8x128xf32>
    tpu.vector_store %arg5[%c2_31, %c0_32, %c0_33], %34 {strides = array<i32>} : memref<8x8x128xf32, #tpu.memory_space<vmem>>, vector<1x8x128xf32>,
    %c0_34 = arith.constant 0 : index
    %c0_35 = arith.constant 0 : index
    %35 = vector.load %arg6[%c0_34, %c0_35] : memref<8x128xf32, #tpu.memory_space<vmem>>, vector<8x128xf32>
    tpu.vector_store %arg6[%c0_34, %c0_35], %31 {strides = array<i32>} : memref<8x128xf32, #tpu.memory_space<vmem>>, vector<8x128xf32>,
    %c0_36 = arith.constant 0 : index
    %c0_37 = arith.constant 0 : index
    %36 = vector.load %arg6[%c0_36, %c0_37] : memref<8x128xf32, #tpu.memory_space<vmem>>, vector<8x128xf32>
    %c0_38 = arith.constant 0 : index
    %c0_39 = arith.constant 0 : index
    %37 = vector.load %arg4[%c0_38, %c0_39] : memref<128x128xf32, #tpu.memory_space<vmem>>, vector<128x128xf32>
    %cst_40 = arith.constant dense<0.000000e+00> : vector<8x128xf32>
    %38 = tpu.matmul %36, %37, %cst_40 {dimension_numbers = #tpu.dot_dimension_numbers<[1], [0], [0], [1], [0, 0, 1, 1], [], []>} : vector<8x128xf32>, vector<128x128xf32>, vector<8x128xf32> -> vector<8x128xf32>
    %c3 = arith.constant 3 : index
    %c0_41 = arith.constant 0 : index
    %c0_42 = arith.constant 0 : index
    %39 = vector.load %arg2[%c3, %c0_41, %c0_42] : memref<8x8x128xf32, #tpu.memory_space<vmem>>, vector<1x8x128xf32>
    %40 = vector.shape_cast %39 : vector<1x8x128xf32> to vector<8x128xf32>
    %41 = arith.addf %40, %38 : vector<8x128xf32>
    %42 = math.tanh %41 : vector<8x128xf32>
    %c3_43 = arith.constant 3 : index
    %c0_44 = arith.constant 0 : index
    %c0_45 = arith.constant 0 : index
    %43 = vector.load %arg5[%c3_43, %c0_44, %c0_45] : memref<8x8x128xf32, #tpu.memory_space<vmem>>, vector<1x8x128xf32>
    %44 = vector.shape_cast %43 : vector<1x8x128xf32> to vector<8x128xf32>
    %45 = vector.shape_cast %42 : vector<8x128xf32> to vector<1x8x128xf32>
    tpu.vector_store %arg5[%c3_43, %c0_44, %c0_45], %45 {strides = array<i32>} : memref<8x8x128xf32, #tpu.memory_space<vmem>>, vector<1x8x128xf32>,
    %c0_46 = arith.constant 0 : index
    %c0_47 = arith.constant 0 : index
    %46 = vector.load %arg6[%c0_46, %c0_47] : memref<8x128xf32, #tpu.memory_space<vmem>>, vector<8x128xf32>
    tpu.vector_store %arg6[%c0_46, %c0_47], %42 {strides = array<i32>} : memref<8x128xf32, #tpu.memory_space<vmem>>, vector<8x128xf32>,
    %c0_48 = arith.constant 0 : index
    %c0_49 = arith.constant 0 : index
    %47 = vector.load %arg6[%c0_48, %c0_49] : memref<8x128xf32, #tpu.memory_space<vmem>>, vector<8x128xf32>
    %c0_50 = arith.constant 0 : index
    %c0_51 = arith.constant 0 : index
    %48 = vector.load %arg4[%c0_50, %c0_51] : memref<128x128xf32, #tpu.memory_space<vmem>>, vector<128x128xf32>
    %cst_52 = arith.constant dense<0.000000e+00> : vector<8x128xf32>
    %49 = tpu.matmul %47, %48, %cst_52 {dimension_numbers = #tpu.dot_dimension_numbers<[1], [0], [0], [1], [0, 0, 1, 1], [], []>} : vector<8x128xf32>, vector<128x128xf32>, vector<8x128xf32> -> vector<8x128xf32>
    %c4 = arith.constant 4 : index
    %c0_53 = arith.constant 0 : index
    %c0_54 = arith.constant 0 : index
    %50 = vector.load %arg2[%c4, %c0_53, %c0_54] : memref<8x8x128xf32, #tpu.memory_space<vmem>>, vector<1x8x128xf32>
    %51 = vector.shape_cast %50 : vector<1x8x128xf32> to vector<8x128xf32>
    %52 = arith.addf %51, %49 : vector<8x128xf32>
    %53 = math.tanh %52 : vector<8x128xf32>
    %c4_55 = arith.constant 4 : index
    %c0_56 = arith.constant 0 : index
    %c0_57 = arith.constant 0 : index
    %54 = vector.load %arg5[%c4_55, %c0_56, %c0_57] : memref<8x8x128xf32, #tpu.memory_space<vmem>>, vector<1x8x128xf32>
    %55 = vector.shape_cast %54 : vector<1x8x128xf32> to vector<8x128xf32>
    %56 = vector.shape_cast %53 : vector<8x128xf32> to vector<1x8x128xf32>
    tpu.vector_store %arg5[%c4_55, %c0_56, %c0_57], %56 {strides = array<i32>} : memref<8x8x128xf32, #tpu.memory_space<vmem>>, vector<1x8x128xf32>,
    %c0_58 = arith.constant 0 : index
    %c0_59 = arith.constant 0 : index
    %57 = vector.load %arg6[%c0_58, %c0_59] : memref<8x128xf32, #tpu.memory_space<vmem>>, vector<8x128xf32>
    tpu.vector_store %arg6[%c0_58, %c0_59], %53 {strides = array<i32>} : memref<8x128xf32, #tpu.memory_space<vmem>>, vector<8x128xf32>,
    %c0_60 = arith.constant 0 : index
    %c0_61 = arith.constant 0 : index
    %58 = vector.load %arg6[%c0_60, %c0_61] : memref<8x128xf32, #tpu.memory_space<vmem>>, vector<8x128xf32>
    %c0_62 = arith.constant 0 : index
    %c0_63 = arith.constant 0 : index
    %59 = vector.load %arg4[%c0_62, %c0_63] : memref<128x128xf32, #tpu.memory_space<vmem>>, vector<128x128xf32>
    %cst_64 = arith.constant dense<0.000000e+00> : vector<8x128xf32>
    %60 = tpu.matmul %58, %59, %cst_64 {dimension_numbers = #tpu.dot_dimension_numbers<[1], [0], [0], [1], [0, 0, 1, 1], [], []>} : vector<8x128xf32>, vector<128x128xf32>, vector<8x128xf32> -> vector<8x128xf32>
    %c5 = arith.constant 5 : index
    %c0_65 = arith.constant 0 : index
    %c0_66 = arith.constant 0 : index
    %61 = vector.load %arg2[%c5, %c0_65, %c0_66] : memref<8x8x128xf32, #tpu.memory_space<vmem>>, vector<1x8x128xf32>
    %62 = vector.shape_cast %61 : vector<1x8x128xf32> to vector<8x128xf32>
    %63 = arith.addf %62, %60 : vector<8x128xf32>
    %64 = math.tanh %63 : vector<8x128xf32>
    %c5_67 = arith.constant 5 : index
    %c0_68 = arith.constant 0 : index
    %c0_69 = arith.constant 0 : index
    %65 = vector.load %arg5[%c5_67, %c0_68, %c0_69] : memref<8x8x128xf32, #tpu.memory_space<vmem>>, vector<1x8x128xf32>
    %66 = vector.shape_cast %65 : vector<1x8x128xf32> to vector<8x128xf32>
    %67 = vector.shape_cast %64 : vector<8x128xf32> to vector<1x8x128xf32>
    tpu.vector_store %arg5[%c5_67, %c0_68, %c0_69], %67 {strides = array<i32>} : memref<8x8x128xf32, #tpu.memory_space<vmem>>, vector<1x8x128xf32>,
    %c0_70 = arith.constant 0 : index
    %c0_71 = arith.constant 0 : index
    %68 = vector.load %arg6[%c0_70, %c0_71] : memref<8x128xf32, #tpu.memory_space<vmem>>, vector<8x128xf32>
    tpu.vector_store %arg6[%c0_70, %c0_71], %64 {strides = array<i32>} : memref<8x128xf32, #tpu.memory_space<vmem>>, vector<8x128xf32>,
    %c0_72 = arith.constant 0 : index
    %c0_73 = arith.constant 0 : index
    %69 = vector.load %arg6[%c0_72, %c0_73] : memref<8x128xf32, #tpu.memory_space<vmem>>, vector<8x128xf32>
    %c0_74 = arith.constant 0 : index
    %c0_75 = arith.constant 0 : index
    %70 = vector.load %arg4[%c0_74, %c0_75] : memref<128x128xf32, #tpu.memory_space<vmem>>, vector<128x128xf32>
    %cst_76 = arith.constant dense<0.000000e+00> : vector<8x128xf32>
    %71 = tpu.matmul %69, %70, %cst_76 {dimension_numbers = #tpu.dot_dimension_numbers<[1], [0], [0], [1], [0, 0, 1, 1], [], []>} : vector<8x128xf32>, vector<128x128xf32>, vector<8x128xf32> -> vector<8x128xf32>
    %c6 = arith.constant 6 : index
    %c0_77 = arith.constant 0 : index
    %c0_78 = arith.constant 0 : index
    %72 = vector.load %arg2[%c6, %c0_77, %c0_78] : memref<8x8x128xf32, #tpu.memory_space<vmem>>, vector<1x8x128xf32>
    %73 = vector.shape_cast %72 : vector<1x8x128xf32> to vector<8x128xf32>
    %74 = arith.addf %73, %71 : vector<8x128xf32>
    %75 = math.tanh %74 : vector<8x128xf32>
    %c6_79 = arith.constant 6 : index
    %c0_80 = arith.constant 0 : index
    %c0_81 = arith.constant 0 : index
    %76 = vector.load %arg5[%c6_79, %c0_80, %c0_81] : memref<8x8x128xf32, #tpu.memory_space<vmem>>, vector<1x8x128xf32>
    %77 = vector.shape_cast %76 : vector<1x8x128xf32> to vector<8x128xf32>
    %78 = vector.shape_cast %75 : vector<8x128xf32> to vector<1x8x128xf32>
    tpu.vector_store %arg5[%c6_79, %c0_80, %c0_81], %78 {strides = array<i32>} : memref<8x8x128xf32, #tpu.memory_space<vmem>>, vector<1x8x128xf32>,
    %c0_82 = arith.constant 0 : index
    %c0_83 = arith.constant 0 : index
    %79 = vector.load %arg6[%c0_82, %c0_83] : memref<8x128xf32, #tpu.memory_space<vmem>>, vector<8x128xf32>
    tpu.vector_store %arg6[%c0_82, %c0_83], %75 {strides = array<i32>} : memref<8x128xf32, #tpu.memory_space<vmem>>, vector<8x128xf32>,
    %c0_84 = arith.constant 0 : index
    %c0_85 = arith.constant 0 : index
    %80 = vector.load %arg6[%c0_84, %c0_85] : memref<8x128xf32, #tpu.memory_space<vmem>>, vector<8x128xf32>
    %c0_86 = arith.constant 0 : index
    %c0_87 = arith.constant 0 : index
    %81 = vector.load %arg4[%c0_86, %c0_87] : memref<128x128xf32, #tpu.memory_space<vmem>>, vector<128x128xf32>
    %cst_88 = arith.constant dense<0.000000e+00> : vector<8x128xf32>
    %82 = tpu.matmul %80, %81, %cst_88 {dimension_numbers = #tpu.dot_dimension_numbers<[1], [0], [0], [1], [0, 0, 1, 1], [], []>} : vector<8x128xf32>, vector<128x128xf32>, vector<8x128xf32> -> vector<8x128xf32>
    %c7 = arith.constant 7 : index
    %c0_89 = arith.constant 0 : index
    %c0_90 = arith.constant 0 : index
    %83 = vector.load %arg2[%c7, %c0_89, %c0_90] : memref<8x8x128xf32, #tpu.memory_space<vmem>>, vector<1x8x128xf32>
    %84 = vector.shape_cast %83 : vector<1x8x128xf32> to vector<8x128xf32>
    %85 = arith.addf %84, %82 : vector<8x128xf32>
    %86 = math.tanh %85 : vector<8x128xf32>
    %c7_91 = arith.constant 7 : index
    %c0_92 = arith.constant 0 : index
    %c0_93 = arith.constant 0 : index
    %87 = vector.load %arg5[%c7_91, %c0_92, %c0_93] : memref<8x8x128xf32, #tpu.memory_space<vmem>>, vector<1x8x128xf32>
    %88 = vector.shape_cast %87 : vector<1x8x128xf32> to vector<8x128xf32>
    %89 = vector.shape_cast %86 : vector<8x128xf32> to vector<1x8x128xf32>
    tpu.vector_store %arg5[%c7_91, %c0_92, %c0_93], %89 {strides = array<i32>} : memref<8x8x128xf32, #tpu.memory_space<vmem>>, vector<1x8x128xf32>,
    %c0_94 = arith.constant 0 : index
    %c0_95 = arith.constant 0 : index
    %90 = vector.load %arg6[%c0_94, %c0_95] : memref<8x128xf32, #tpu.memory_space<vmem>>, vector<8x128xf32>
    tpu.vector_store %arg6[%c0_94, %c0_95], %86 {strides = array<i32>} : memref<8x128xf32, #tpu.memory_space<vmem>>, vector<8x128xf32>,
    return
  }
  func.func @transform_0(%arg0: i32, %arg1: i32) -> (i32, i32, i32) {
    %c0_i32 = arith.constant 0 : i32
    %c0_i32_0 = arith.constant 0 : i32
    return %arg1, %arg0, %c0_i32 : i32, i32, i32
  }
  func.func @transform_1(%arg0: i32, %arg1: i32) -> (i32, i32) {
    %c0_i32 = arith.constant 0 : i32
    %c0_i32_0 = arith.constant 0 : i32
    return %arg0, %c0_i32 : i32, i32
  }
  func.func @transform_2(%arg0: i32, %arg1: i32) -> (i32, i32) {
    %c0_i32 = arith.constant 0 : i32
    %c0_i32_0 = arith.constant 0 : i32
    %c0_i32_1 = arith.constant 0 : i32
    return %c0_i32, %c0_i32_0 : i32, i32
  }
  func.func @transform_3(%arg0: i32, %arg1: i32) -> (i32, i32, i32) {
    %c0_i32 = arith.constant 0 : i32
    %c0_i32_0 = arith.constant 0 : i32
    return %arg1, %arg0, %c0_i32 : i32, i32, i32
  }
}

</mosaic_0001>

<bundles_post_ra>
// kernel: tpu_custom_call.1
= control target key start
LH: loop header
LB: loop body
LE: loop exit
PB: predicated region body
PF: predicated region fallthrough
CT: control target
= control target key end

     0   :  { %8 = vsyncpa [#allocation4], 0  ;;  %s767_s0 = inlined_call_operand.hbm [shape: f32[8,8,128], index: 0, kind: input, shape index: {}]   ;;  %s768_s1 = inlined_call_operand.hbm [shape: f32[8,128], index: 1, kind: input, shape index: {}]   ;;  %s769_s2 = inlined_call_operand.hbm [shape: f32[128,128], index: 2, kind: input, shape index: {}]   ;;  %s770_s3 = inlined_call_operand.hbm [shape: f32[8,8,128], index: 3, kind: output, shape index: {}]  }
   0x1   :  { %9 = vsyncpa [#allocation7], 0  ;;  %s29_s14 = sshll.u32 %s768_s1, 4  ;;  %s30_s14 = int_to_ptr.hbm [resolvable:$true] %s29_s14 }
   0x2   :  { %10 = vsyncpa [#allocation5], 0  ;;  %s560_s15 = smov [#allocation6]   ;;  %s15_s19 = sshll.u32 %s767_s0, 4  ;;  %s16_s19 = int_to_ptr.hbm [resolvable:$true] %s15_s19 }
   0x3   :  { %s31_s16 = sshll.u32 %s560_s15, 4  ;;  %s561_s20 = smov [#allocation3]   ;;  %s32_s16 = int_to_ptr.vmem [resolvable:$true] %s31_s16 }
   0x4   :  { %34 = dma.hbm_to_vmem [thread:$0]  %s30_s14, 128, %s32_s16, [#allocation7]  }
   0x5   :  { %s17_s21 = sshll.u32 %s561_s20, 4  ;;  %s562_s22 = smov 128   ;;  %s18_s21 = int_to_ptr.vmem [resolvable:$true] %s17_s21 }
   0x6   :  { %s563_s23 = smov 8   ;;  %s39_s25 = sshll.u32 %s769_s2, 4  ;;  %s40_s25 = int_to_ptr.hbm [resolvable:$true] %s39_s25 }
   0x7   :  { %23 = dma.hbm_to_vmem [thread:$0]  %s16_s19, 1024, %s18_s21, [#allocation4], %s562_s22, %s562_s22, %s563_s23  }
   0x8   :  { %s564_s26 = smov [#allocation8]  }
   0x9   :  { %s41_s27 = sshll.u32 %s564_s26, 4  ;;  %s42_s27 = int_to_ptr.vmem [resolvable:$true] %s41_s27 }
   0xa   :  { %47 = dma.hbm_to_vmem [thread:$0]  %s40_s25, 2048, %s42_s27, [#allocation7], %s562_s22, %s562_s22, %s563_s23  }
   0xb   :  { %554 = dma.done.wait [#allocation4], 1024  }
   0xc   :  { %555 = vsyncadd [#allocation4], 4294966272 }
   0xd   :  { %556 = dma.done.wait [#allocation7], 2176  }
   0xe   :  { %557 = vsyncadd [#allocation7], 4294965120  ;;  %v601_v0 = vld [vmem:[#allocation8 + $0x78] sm:$0xff]  ;;  %v603_v1 = vld [vmem:[#allocation8 + $0x70] sm:$0xff]  ;;  %s565_s0 = smov [#allocation9]   ;;  %s422_s30 = sshll.u32 %s770_s3, 4  ;;  %s423_s30 = int_to_ptr.hbm [resolvable:$true] %s422_s30 }
   0xf   :  { %83 = vmatpush.msra.mxu0 %v601_v0  ;;  %125 = vmatpush.msra.mxu1 %v601_v0  ;;  %v607_v2 = vld [vmem:[#allocation8 + $0x68] sm:$0xff]  ;;  %v613_v3 = vld [vmem:[#allocation8 + $0x60] sm:$0xff]  ;;  %v619_v4 = vld [vmem:[#allocation8 + $0x58] sm:$0xff]  ;;  %s420_s2 = sshll.u32 %s565_s0, 4  ;;  %s421_s2 = int_to_ptr.vmem [resolvable:$true] %s420_s2 }
  0x10   :  { %169 = vmatpush.msra.mxu2 %v601_v0  ;;  %213 = vmatpush.msra.mxu3 %v601_v0  ;;  %v625_v5 = vld [vmem:[#allocation8 + $0x50] sm:$0xff]  ;;  %v631_v6 = vld [vmem:[#allocation8 + $0x48] sm:$0xff]  ;;  %v637_v7 = vld [vmem:[#allocation8 + $0x40] sm:$0xff] }
  0x11   :  { %84 = vmatpush.msra.mxu0 %v603_v1  ;;  %126 = vmatpush.msra.mxu1 %v603_v1  ;;  %v643_v8 = vld [vmem:[#allocation8 + $0x38] sm:$0xff]  ;;  %v649_v9 = vld [vmem:[#allocation8 + $0x30] sm:$0xff]  ;;  %v655_v10 = vld [vmem:[#allocation8 + $0x28] sm:$0xff] }
  0x12   :  { %170 = vmatpush.msra.mxu2 %v603_v1  ;;  %214 = vmatpush.msra.mxu3 %v603_v1  ;;  %v661_v11 = vld [vmem:[#allocation8 + $0x20] sm:$0xff]  ;;  %v667_v12 = vld [vmem:[#allocation8 + $0x18] sm:$0xff]  ;;  %v673_v13 = vld [vmem:[#allocation8 + $0x10] sm:$0xff] }
  0x13   :  { %85 = vmatpush.msra.mxu0 %v607_v2  ;;  %127 = vmatpush.msra.mxu1 %v607_v2  ;;  %v679_v14 = vld [vmem:[#allocation8 + $0x8] sm:$0xff]  ;;  %v685_v15 = vld [vmem:[#allocation8] sm:$0xff]  ;;  %v64_v16 = vld [vmem:[#allocation6] sm:$0xff] }
  0x14   :  { %171 = vmatpush.msra.mxu2 %v607_v2  ;;  %215 = vmatpush.msra.mxu3 %v607_v2  ;;  %v103_v17 = vld [vmem:[#allocation3] sm:$0xff]  ;;  %v146_v21 = vld [vmem:[#allocation3 + $0x8] sm:$0xff]  ;;  %v190_v25 = vld [vmem:[#allocation3 + $0x10] sm:$0xff] }
  0x15   :  { %86 = vmatpush.msra.mxu0 %v613_v3  ;;  %128 = vmatpush.msra.mxu1 %v613_v3  ;;  %v234_v29 = vld [vmem:[#allocation3 + $0x18] sm:$0xff]  ;;  %v278_v33 = vld [vmem:[#allocation3 + $0x20] sm:$0xff]  ;;  %v322_v37 = vld [vmem:[#allocation3 + $0x28] sm:$0xff] }
  0x16   :  { %172 = vmatpush.msra.mxu2 %v613_v3  ;;  %216 = vmatpush.msra.mxu3 %v613_v3  ;;  %v366_v41 = vld [vmem:[#allocation3 + $0x30] sm:$0xff]  ;;  %v410_v45 = vld [vmem:[#allocation3 + $0x38] sm:$0xff] }
  0x17   :  { %87 = vmatpush.msra.mxu0 %v619_v4  ;;  %129 = vmatpush.msra.mxu1 %v619_v4 }
  0x18   :  { %173 = vmatpush.msra.mxu2 %v619_v4  ;;  %217 = vmatpush.msra.mxu3 %v619_v4 }
  0x19   :  { %88 = vmatpush.msra.mxu0 %v625_v5  ;;  %130 = vmatpush.msra.mxu1 %v625_v5 }
  0x1a   :  { %174 = vmatpush.msra.mxu2 %v625_v5  ;;  %218 = vmatpush.msra.mxu3 %v625_v5 }
  0x1b   :  { %89 = vmatpush.msra.mxu0 %v631_v6  ;;  %131 = vmatpush.msra.mxu1 %v631_v6 }
  0x1c   :  { %175 = vmatpush.msra.mxu2 %v631_v6  ;;  %219 = vmatpush.msra.mxu3 %v631_v6 }
  0x1d   :  { %90 = vmatpush.msra.mxu0 %v637_v7  ;;  %132 = vmatpush.msra.mxu1 %v637_v7 }
  0x1e   :  { %176 = vmatpush.msra.mxu2 %v637_v7  ;;  %220 = vmatpush.msra.mxu3 %v637_v7 }
  0x1f   :  { %91 = vmatpush.msra.mxu0 %v643_v8  ;;  %133 = vmatpush.msra.mxu1 %v643_v8 }
  0x20   :  { %177 = vmatpush.msra.mxu2 %v643_v8  ;;  %221 = vmatpush.msra.mxu3 %v643_v8 }
  0x21   :  { %92 = vmatpush.msra.mxu0 %v649_v9  ;;  %134 = vmatpush.msra.mxu1 %v649_v9 }
  0x22   :  { %178 = vmatpush.msra.mxu2 %v649_v9  ;;  %222 = vmatpush.msra.mxu3 %v649_v9 }
  0x23   :  { %93 = vmatpush.msra.mxu0 %v655_v10  ;;  %135 = vmatpush.msra.mxu1 %v655_v10 }
  0x24   :  { %179 = vmatpush.msra.mxu2 %v655_v10  ;;  %223 = vmatpush.msra.mxu3 %v655_v10 }
  0x25   :  { %94 = vmatpush.msra.mxu0 %v661_v11  ;;  %136 = vmatpush.msra.mxu1 %v661_v11 }
  0x26   :  { %180 = vmatpush.msra.mxu2 %v661_v11  ;;  %224 = vmatpush.msra.mxu3 %v661_v11 }
  0x27   :  { %95 = vmatpush.msra.mxu0 %v667_v12  ;;  %137 = vmatpush.msra.mxu1 %v667_v12 }
  0x28   :  { %181 = vmatpush.msra.mxu2 %v667_v12  ;;  %225 = vmatpush.msra.mxu3 %v667_v12 }
  0x29   :  { %96 = vmatpush.msra.mxu0 %v673_v13  ;;  %138 = vmatpush.msra.mxu1 %v673_v13 }
  0x2a   :  { %182 = vmatpush.msra.mxu2 %v673_v13  ;;  %226 = vmatpush.msra.mxu3 %v673_v13 }
  0x2b   :  { %97 = vmatpush.msra.mxu0 %v679_v14  ;;  %139 = vmatpush.msra.mxu1 %v679_v14 }
  0x2c   :  { %183 = vmatpush.msra.mxu2 %v679_v14  ;;  %227 = vmatpush.msra.mxu3 %v679_v14 }
  0x2d   :  { %98 = vmatpush.msra.mxu0 %v685_v15  ;;  %140 = vmatpush.msra.mxu1 %v685_v15 }
  0x2e   :  { %99 = vmatmul.f32.vlgmr.msra.gmra.mxu0 %v64_v16  ;;  %184 = vmatpush.msra.mxu2 %v685_v15 }
  0x2f   :  { %228 = vmatpush.msra.mxu3 %v685_v15  ;;  %257 = vmatpush.msrb.mxu0 %v601_v0 }
  0x30   :  { %301 = vmatpush.msrb.mxu1 %v601_v0  ;;  %345 = vmatpush.msrb.mxu2 %v601_v0 }
  0x31   :  { %258 = vmatpush.msrb.mxu0 %v603_v1  ;;  %389 = vmatpush.msrb.mxu3 %v601_v0 }
  0x32   :  { %302 = vmatpush.msrb.mxu1 %v603_v1  ;;  %346 = vmatpush.msrb.mxu2 %v603_v1 }
  0x33   :  { %259 = vmatpush.msrb.mxu0 %v607_v2  ;;  %390 = vmatpush.msrb.mxu3 %v603_v1 }
  0x34   :  { %303 = vmatpush.msrb.mxu1 %v607_v2  ;;  %347 = vmatpush.msrb.mxu2 %v607_v2 }
  0x35   :  { %260 = vmatpush.msrb.mxu0 %v613_v3  ;;  %391 = vmatpush.msrb.mxu3 %v607_v2 }
  0x36   :  { %304 = vmatpush.msrb.mxu1 %v613_v3  ;;  %348 = vmatpush.msrb.mxu2 %v613_v3 }
  0x37   :  { %261 = vmatpush.msrb.mxu0 %v619_v4  ;;  %392 = vmatpush.msrb.mxu3 %v613_v3 }
  0x38   :  { %305 = vmatpush.msrb.mxu1 %v619_v4  ;;  %349 = vmatpush.msrb.mxu2 %v619_v4 }
  0x39   :  { %262 = vmatpush.msrb.mxu0 %v625_v5  ;;  %393 = vmatpush.msrb.mxu3 %v619_v4 }
  0x3a   :  { %306 = vmatpush.msrb.mxu1 %v625_v5  ;;  %350 = vmatpush.msrb.mxu2 %v625_v5 }
  0x3b   :  { %263 = vmatpush.msrb.mxu0 %v631_v6  ;;  %394 = vmatpush.msrb.mxu3 %v625_v5 }
  0x3c   :  { %307 = vmatpush.msrb.mxu1 %v631_v6  ;;  %351 = vmatpush.msrb.mxu2 %v631_v6 }
  0x3d   :  { %264 = vmatpush.msrb.mxu0 %v637_v7  ;;  %395 = vmatpush.msrb.mxu3 %v631_v6 }
  0x3e   :  { %308 = vmatpush.msrb.mxu1 %v637_v7  ;;  %352 = vmatpush.msrb.mxu2 %v637_v7 }
  0x3f   :  { %265 = vmatpush.msrb.mxu0 %v643_v8  ;;  %396 = vmatpush.msrb.mxu3 %v637_v7 }
  0x40   :  { %309 = vmatpush.msrb.mxu1 %v643_v8  ;;  %353 = vmatpush.msrb.mxu2 %v643_v8 }
  0x41   :  { %266 = vmatpush.msrb.mxu0 %v649_v9  ;;  %397 = vmatpush.msrb.mxu3 %v643_v8 }
  0x42   :  { %310 = vmatpush.msrb.mxu1 %v649_v9  ;;  %354 = vmatpush.msrb.mxu2 %v649_v9 }
  0x43   :  { %267 = vmatpush.msrb.mxu0 %v655_v10  ;;  %398 = vmatpush.msrb.mxu3 %v649_v9 }
  0x44   :  { %311 = vmatpush.msrb.mxu1 %v655_v10  ;;  %355 = vmatpush.msrb.mxu2 %v655_v10 }
  0x45   :  { %268 = vmatpush.msrb.mxu0 %v661_v11  ;;  %399 = vmatpush.msrb.mxu3 %v655_v10 }
  0x46   :  { %312 = vmatpush.msrb.mxu1 %v661_v11  ;;  %356 = vmatpush.msrb.mxu2 %v661_v11 }
  0x47   :  { %269 = vmatpush.msrb.mxu0 %v667_v12  ;;  %400 = vmatpush.msrb.mxu3 %v661_v11 }
  0x48   :  { %313 = vmatpush.msrb.mxu1 %v667_v12  ;;  %357 = vmatpush.msrb.mxu2 %v667_v12 }
  0x49   :  { %270 = vmatpush.msrb.mxu0 %v673_v13  ;;  %401 = vmatpush.msrb.mxu3 %v667_v12 }
  0x4a   :  { %314 = vmatpush.msrb.mxu1 %v673_v13  ;;  %358 = vmatpush.msrb.mxu2 %v673_v13 }
  0x4b   :  { %271 = vmatpush.msrb.mxu0 %v679_v14  ;;  %402 = vmatpush.msrb.mxu3 %v673_v13 }
  0x4c   :  { %315 = vmatpush.msrb.mxu1 %v679_v14  ;;  %359 = vmatpush.msrb.mxu2 %v679_v14 }
  0x4d   :  { %272 = vmatpush.msrb.mxu0 %v685_v15  ;;  %403 = vmatpush.msrb.mxu3 %v679_v14 }
  0x4e   :  { %316 = vmatpush.msrb.mxu1 %v685_v15  ;;  %360 = vmatpush.msrb.mxu2 %v685_v15 }
  0x4f   :  { %404 = vmatpush.msrb.mxu3 %v685_v15 }
  0xab   :  { %v100_v18 = vpop.f32.mrf.mxu0 }
  0xac   :  { %v104_v19 = vadd.f32 %v103_v17, %v100_v18 }
  0xae   :  { %442 = vtanh.f32 %v104_v19 }
  0xb4   :  { %v443_v20 = vpop.eup %442 }
  0xb5   :  { %106 = vst [vmem:[#allocation9] sm:$0xff] %v443_v20  ;;  %141 = vmatmul.f32.vlgmr.msra.gmra.mxu1 %v443_v20 }
 0x132   :  { %v142_v22 = vpop.f32.mrf.mxu1 }
 0x133   :  { %v147_v23 = vadd.f32 %v146_v21, %v142_v22 }
 0x135   :  { %444 = vtanh.f32 %v147_v23 }
 0x13b   :  { %v445_v24 = vpop.eup %444 }
 0x13c   :  { %150 = vst [vmem:[#allocation9 + $0x8] sm:$0xff] %v445_v24  ;;  %185 = vmatmul.f32.vlgmr.msra.gmra.mxu2 %v445_v24 }
 0x1bf   :  { %v186_v26 = vpop.f32.mrf.mxu2 }
 0x1c0   :  { %v191_v27 = vadd.f32 %v190_v25, %v186_v26 }
 0x1c2   :  { %446 = vtanh.f32 %v191_v27 }
 0x1c8   :  { %v447_v28 = vpop.eup %446 }
 0x1c9   :  { %194 = vst [vmem:[#allocation9 + $0x10] sm:$0xff] %v447_v28  ;;  %229 = vmatmul.f32.vlgmr.msra.gmra.mxu3 %v447_v28 }
 0x24c   :  { %v230_v30 = vpop.f32.mrf.mxu3 }
 0x24d   :  { %v235_v31 = vadd.f32 %v234_v29, %v230_v30 }
 0x24f   :  { %448 = vtanh.f32 %v235_v31 }
 0x255   :  { %v449_v32 = vpop.eup %448 }
 0x256   :  { %238 = vst [vmem:[#allocation9 + $0x18] sm:$0xff] %v449_v32  ;;  %273 = vmatmul.f32.vlgmr.msrb.gmra.mxu0 %v449_v32 }
 0x2d3   :  { %v274_v34 = vpop.f32.mrf.mxu0 }
 0x2d4   :  { %v279_v35 = vadd.f32 %v278_v33, %v274_v34 }
 0x2d6   :  { %450 = vtanh.f32 %v279_v35 }
 0x2dc   :  { %v451_v36 = vpop.eup %450 }
 0x2dd   :  { %282 = vst [vmem:[#allocation9 + $0x20] sm:$0xff] %v451_v36  ;;  %317 = vmatmul.f32.vlgmr.msrb.gmra.mxu1 %v451_v36 }
 0x35a   :  { %v318_v38 = vpop.f32.mrf.mxu1 }
 0x35b   :  { %v323_v39 = vadd.f32 %v322_v37, %v318_v38 }
 0x35d   :  { %452 = vtanh.f32 %v323_v39 }
 0x363   :  { %v453_v40 = vpop.eup %452 }
 0x364   :  { %326 = vst [vmem:[#allocation9 + $0x28] sm:$0xff] %v453_v40  ;;  %361 = vmatmul.f32.vlgmr.msrb.gmra.mxu2 %v453_v40 }
 0x3e7   :  { %v362_v42 = vpop.f32.mrf.mxu2 }
 0x3e8   :  { %v367_v43 = vadd.f32 %v366_v41, %v362_v42 }
 0x3ea   :  { %454 = vtanh.f32 %v367_v43 }
 0x3f0   :  { %v455_v44 = vpop.eup %454 }
 0x3f1   :  { %370 = vst [vmem:[#allocation9 + $0x30] sm:$0xff] %v455_v44  ;;  %405 = vmatmul.f32.vlgmr.msrb.gmra.mxu3 %v455_v44 }
 0x474   :  { %v406_v46 = vpop.f32.mrf.mxu3 }
 0x475   :  { %v411_v47 = vadd.f32 %v410_v45, %v406_v46 }
 0x477   :  { %456 = vtanh.f32 %v411_v47 }
 0x47d   :  { %v457_v48 = vpop.eup %456 }
 0x47e   :  { %414 = vst [vmem:[#allocation9 + $0x38] sm:$0xff] %v457_v48 }
 0x47f   :  { %428 = dma.vmem_to_hbm [thread:$0]  %s421_s2, 1024, %s423_s30, [#allocation5], %s562_s22, %s562_s22, %s563_s23  }
 0x480   :  { %558 = dma.done.wait [#allocation5], 1024  }
 0x481   :  { %559 = vsyncadd [#allocation5], 4294966272 }
 0x482   :  { %433 = vsyncpa [#allocation4], 1 }
 0x483   :  { %434 = vsyncpa [#allocation7], 1 }
 0x484   :  { %435 = vsyncpa [#allocation5], 1 }

</bundles_post_ra>
